<compile_context>
chip_gen: v5e
topology: v5e:2x2
jax: 0.10.0
libtpu: 0.0.40
codegen_flags: <defaults>
</compile_context>

<pallas_src>
import functools
import math

import jax
import jax.numpy as jnp
from jax import lax
from jax.experimental import pallas as pl
from jax.experimental.pallas import tpu as pltpu

_LANES = 128
_ACC_ROWS = 64          # resident accumulator rows (8 vregs of add ILP)
_INNER_ROWS = 512       # rows per in-kernel sub-step (keeps f32 temps ~256 KiB)


def _round_up(a, b):
    return ((a + b - 1) // b) * b


def _tpu_config():
    """Returns (physical VMEM bytes, number of 'core chunk' grid slices)."""
    vmem = None
    try:
        vmem = int(getattr(pltpu.get_tpu_info(), "vmem_capacity_bytes", 0)) or None
    except Exception:
        vmem = None
    if vmem is None:
        vmem = 64 * 1024 * 1024          # conservative (v7x-sized) default

    kind = ""
    try:
        kind = (jax.devices()[0].device_kind or "").lower()
    except Exception:
        pass
    if any(tag in kind for tag in ("lite", "v5e", "v6e")):
        chunks = 1                       # single TensorCore per chip
    elif any(tag in kind for tag in ("v4", "v5p", "v7")):
        chunks = 2                       # megacore / dual-TensorCore chips
    else:
        chunks = 2                       # unknown: a size-2 parallel axis is near-free
    return vmem, chunks


def _mse_kernel(x_ref, t_ref, o_ref, *, tile_rows, inner_rows, acc_rows,
                blocks_per_chunk, total_blocks, rows_total,
                need_mask, has_overshoot):
    c = pl.program_id(0)   # core chunk ("parallel")
    i = pl.program_id(1)   # block within chunk ("arbitrary" / reduction)

    # (acc_rows, 128) accumulator slab for this chunk stays resident across i.
    @pl.when(i == 0)
    def _():
        o_ref[...] = jnp.zeros_like(o_ref)

    blk = c * blocks_per_chunk + i
    row_start = blk * tile_rows
    n_inner = tile_rows // inner_rows

    def run(masked):
        def body(s, carry):
            r0 = pl.multiple_of(s * inner_rows, inner_rows)
            xv = x_ref[pl.ds(r0, inner_rows), :].astype(jnp.float32)
            tv = t_ref[pl.ds(r0, inner_rows), :].astype(jnp.float32)
            d = xv - tv
            if masked:
                row_ids = (row_start + r0) + lax.broadcasted_iota(
                    jnp.int32, (inner_rows, 1), 0)
                d = jnp.where(row_ids < rows_total, d, 0.0)
            sq = d * d
            # VPU-only, vreg-aligned partial reduction into the wide slab.
            o_ref[...] += jnp.sum(
                sq.reshape(inner_rows // acc_rows, acc_rows, _LANES), axis=0)
            return carry

        lax.fori_loop(0, n_inner, body, 0)

    if need_mask:
        last = total_blocks - 1

        @pl.when(blk < last)        # interior blocks: unmasked fast path
        def _():
            run(masked=False)

        @pl.when(blk == last)       # ragged last block: mask rows past rows_total
        def _():
            run(masked=True)
        # blk > last (clamped overshoot DMA): compute skipped -> no double count.
    elif has_overshoot:
        @pl.when(blk < total_blocks)
        def _():
            run(masked=False)
    else:
        run(masked=False)


def mse_loss(input_, target, reduction="mean"):
    """Pallas equivalent of MSE.forward (reduction in {'mean', 'sum'})."""
    if input_.shape != target.shape:
        raise ValueError("Input and target shapes should be same")
    if reduction not in ("mean", "sum"):
        raise ValueError("reduction must be 'mean' or 'sum'")

    numel = math.prod(input_.shape)
    if numel == 0:  # match torch: mean of empty -> nan, sum -> 0
        return jnp.float32(float("nan")) if reduction == "mean" else jnp.float32(0.0)

    x = jnp.ravel(input_)
    t = jnp.ravel(target)

    rows = numel // _LANES
    tail_len = numel - rows * _LANES

    # <=127 trailing elements: tiny wrapper-side op instead of re-padding/copying
    # both full operands.
    tail_sum = None
    if tail_len:
        xt = x[rows * _LANES:].astype(jnp.float32)
        tt = t[rows * _LANES:].astype(jnp.float32)
        tail_sum = jnp.sum((xt - tt) * (xt - tt))

    if rows == 0:
        total = tail_sum
    else:
        if tail_len:
            # TODO(synk): this rare ragged path still costs one prefix copy of
            # each operand; the 128-aligned path below is zero-copy.
            x_main = x[: rows * _LANES]
            t_main = t[: rows * _LANES]
        else:
            x_main, t_main = x, t
        x2d = x_main.reshape(rows, _LANES)
        t2d = t_main.reshape(rows, _LANES)

        vmem_phys, n_core_chunks = _tpu_config()
        itemsize = max(x2d.dtype.itemsize, t2d.dtype.itemsize)
        # ~8 MiB per-input tiles on 128 MiB-VMEM chips (v5e/v6e), ~4 MiB on
        # 64 MiB chips (v7x); dtype-aware so bf16/int8 stream the same bytes.
        tile_bytes = (8 << 20) if vmem_phys >= (96 << 20) else (4 << 20)
        target_rows = tile_bytes // (_LANES * itemsize)   # multiple of 512

        if rows < _INNER_ROWS:
            tile_rows = _round_up(rows, 32)   # 32 covers f32/bf16/int8 packing
            inner_rows = tile_rows
        else:
            inner_rows = _INNER_ROWS
            tile_rows = max(inner_rows,
                            min(target_rows, _round_up(rows, inner_rows)))
        acc_rows = _ACC_ROWS if inner_rows % _ACC_ROWS == 0 else 32

        total_blocks = pl.cdiv(rows, tile_rows)
        chunks = min(n_core_chunks, total_blocks)
        blocks_per_chunk = pl.cdiv(total_blocks, chunks)
        need_mask = (rows % tile_rows) != 0
        has_overshoot = chunks * blocks_per_chunk > total_blocks

        def in_map(c, i):
            # Clamp so an overshoot step never issues an out-of-bounds DMA; its
            # compute is skipped in-kernel.
            return (jnp.minimum(c * blocks_per_chunk + i, total_blocks - 1), 0)

        kernel = functools.partial(
            _mse_kernel,
            tile_rows=tile_rows, inner_rows=inner_rows, acc_rows=acc_rows,
            blocks_per_chunk=blocks_per_chunk, total_blocks=total_blocks,
            rows_total=rows, need_mask=need_mask, has_overshoot=has_overshoot)

        # Double-buffered input tiles dominate VMEM; temps stay <~1 MiB.
        working_set = 2 * tile_rows * _LANES * (
            x2d.dtype.itemsize + t2d.dtype.itemsize)
        vmem_limit = max(32 << 20,
                         min(int(vmem_phys * 3 // 4), working_set + (16 << 20)))

        partials = pl.pallas_call(
            kernel,
            out_shape=jax.ShapeDtypeStruct((chunks * acc_rows, _LANES),
                                           jnp.float32),
            grid_spec=pltpu.PrefetchScalarGridSpec(
                num_scalar_prefetch=0,
                grid=(chunks, blocks_per_chunk),
                in_specs=[
                    pl.BlockSpec((tile_rows, _LANES), in_map),
                    pl.BlockSpec((tile_rows, _LANES), in_map),
                ],
                out_specs=pl.BlockSpec((acc_rows, _LANES), lambda c, i: (c, 0)),
            ),
            compiler_params=pltpu.CompilerParams(
                # TODO(synk): on v7x, confirm the leading "parallel" axis shards
                # across both TensorCores; if the trace shows single-TC
                # occupancy, switch it to pltpu.CORE_PARALLEL.
                dimension_semantics=("parallel", "arbitrary"),
                vmem_limit_bytes=vmem_limit,
            ),
        )(x2d, t2d)

        # Single tiny cross-lane reduction of the per-chunk partial slabs.
        total = jnp.sum(partials)
        if tail_sum is not None:
            total = total + tail_sum

    if reduction == "mean":
        total = total / jnp.float32(numel)
    # PyTorch returns a 0-dim tensor for mean/sum.
    return total


if __name__ == "__main__":
    key = jax.random.PRNGKey(0)
    k1, k2 = jax.random.split(key)
    # NCHW: batch=2, channels=4, spatial=16x16
    x = jax.random.normal(k1, (2, 4, 16, 16), dtype=jnp.float32)
    y = jax.random.normal(k2, (2, 4, 16, 16), dtype=jnp.float32)

    loss_mean = jax.block_until_ready(mse_loss(x, y, reduction="mean"))
    loss_sum = jax.block_until_ready(mse_loss(x, y, reduction="sum"))

    ref_mean = jnp.mean((x - y) ** 2)
    ref_sum = jnp.sum((x - y) ** 2)

    assert jnp.allclose(loss_mean, ref_mean, rtol=1e-5, atol=1e-5)
    assert jnp.allclose(loss_sum, ref_sum, rtol=1e-5, atol=1e-4)

    print("KERNEL_OK")
</pallas_src>

<mosaic_0001>
module attributes {stable_mosaic.version = 11 : i64} {
  func.func @_mse_kernel(%arg0: i32, %arg1: i32, %arg2: memref<32x128xf32, #tpu.memory_space<vmem>>, %arg3: memref<32x128xf32, #tpu.memory_space<vmem>>, %arg4: memref<32x128xf32, #tpu.memory_space<vmem>>) attributes {dimension_semantics = [#tpu.dimension_semantics<parallel>, #tpu.dimension_semantics<arbitrary>], iteration_bounds = array<i64: 1, 1>, scalar_prefetch = 0 : i64, scratch_operands = 0 : i64, tpu.core_type = #tpu.core_type<tc>, window_params = [{transform_indices = @transform_0, window_bounds = array<i64: 32, 128>}, {transform_indices = @transform_1, window_bounds = array<i64: 32, 128>}, {transform_indices = @transform_2, window_bounds = array<i64: 32, 128>}]} {
    %c0_i32 = arith.constant 0 : i32
    %0 = arith.cmpi eq, %arg1, %c0_i32 : i32
    %1 = arith.extui %0 : i1 to i32
    %c0_i32_0 = arith.constant 0 : i32
    %2 = arith.cmpi ne, %1, %c0_i32_0 : i32
    scf.if %2 {
      %cst = arith.constant 0.000000e+00 : f32
      %12 = vector.broadcast %cst : f32 to vector<32x128xf32>
      %c0 = arith.constant 0 : index
      %c0_5 = arith.constant 0 : index
      %13 = vector.load %arg4[%c0, %c0_5] : memref<32x128xf32, #tpu.memory_space<vmem>>, vector<32x128xf32>
      tpu.vector_store %arg4[%c0, %c0_5], %12 {strides = array<i32>} : memref<32x128xf32, #tpu.memory_space<vmem>>, vector<32x128xf32>,
    } else {
    }
    %c1_i32 = arith.constant 1 : i32
    %3 = arith.muli %arg0, %c1_i32 : i32
    %4 = arith.addi %3, %arg1 : i32
    %c32_i32 = arith.constant 32 : i32
    %5 = arith.muli %4, %c32_i32 : i32
    %c0_i32_1 = arith.constant 0 : i32
    %6 = arith.cmpi slt, %4, %c0_i32_1 : i32
    %7 = arith.extui %6 : i1 to i32
    %c0_i32_2 = arith.constant 0 : i32
    %8 = arith.cmpi ne, %7, %c0_i32_2 : i32
    scf.if %8 {
      %c0_i32_5 = arith.constant 0 : i32
      %c32_i32_6 = arith.constant 32 : i32
      %12 = arith.muli %c0_i32_5, %c32_i32_6 : i32
      %13 = tpu.assume_multiple %12, 32 : i32
      %14 = arith.index_cast %13 : i32 to index
      %c0 = arith.constant 0 : index
      %15 = vector.load %arg2[%14, %c0] : memref<32x128xf32, #tpu.memory_space<vmem>>, vector<32x128xf32>
      %16 = arith.index_cast %13 : i32 to index
      %c0_7 = arith.constant 0 : index
      %17 = vector.load %arg3[%16, %c0_7] : memref<32x128xf32, #tpu.memory_space<vmem>>, vector<32x128xf32>
      %18 = arith.subf %15, %17 : vector<32x128xf32>
      %19 = arith.mulf %18, %18 : vector<32x128xf32>
      %c0_8 = arith.constant 0 : index
      %c0_9 = arith.constant 0 : index
      %20 = vector.load %arg4[%c0_8, %c0_9] : memref<32x128xf32, #tpu.memory_space<vmem>>, vector<32x128xf32>
      %21 = vector.shape_cast %19 : vector<32x128xf32> to vector<1x32x128xf32>
      %cst = arith.constant dense<0.000000e+00> : vector<32x128xf32>
      %22 = vector.multi_reduction <add>, %21, %cst [0] : vector<1x32x128xf32> to vector<32x128xf32>
      %23 = arith.addf %20, %22 : vector<32x128xf32>
      %c0_10 = arith.constant 0 : index
      %c0_11 = arith.constant 0 : index
      %24 = vector.load %arg4[%c0_10, %c0_11] : memref<32x128xf32, #tpu.memory_space<vmem>>, vector<32x128xf32>
      tpu.vector_store %arg4[%c0_10, %c0_11], %23 {strides = array<i32>} : memref<32x128xf32, #tpu.memory_space<vmem>>, vector<32x128xf32>,
      %c1_i32_12 = arith.constant 1 : i32
    } else {
    }
    %c0_i32_3 = arith.constant 0 : i32
    %9 = arith.cmpi eq, %4, %c0_i32_3 : i32
    %10 = arith.extui %9 : i1 to i32
    %c0_i32_4 = arith.constant 0 : i32
    %11 = arith.cmpi ne, %10, %c0_i32_4 : i32
    scf.if %11 {
      %c0_i32_5 = arith.constant 0 : i32
      %c32_i32_6 = arith.constant 32 : i32
      %12 = arith.muli %c0_i32_5, %c32_i32_6 : i32
      %13 = tpu.assume_multiple %12, 32 : i32
      %14 = arith.index_cast %13 : i32 to index
      %c0 = arith.constant 0 : index
      %15 = vector.load %arg2[%14, %c0] : memref<32x128xf32, #tpu.memory_space<vmem>>, vector<32x128xf32>
      %16 = arith.index_cast %13 : i32 to index
      %c0_7 = arith.constant 0 : index
      %17 = vector.load %arg3[%16, %c0_7] : memref<32x128xf32, #tpu.memory_space<vmem>>, vector<32x128xf32>
      %18 = arith.subf %15, %17 : vector<32x128xf32>
      %19 = arith.addi %5, %13 : i32
      %20 = tpu.iota {dimensions = array<i32: 0>} : vector<32x1xi32>
      %21 = vector.broadcast %19 : i32 to vector<32x1xi32>
      %22 = arith.addi %21, %20 : vector<32x1xi32>
      %c16_i32 = arith.constant 16 : i32
      %23 = vector.broadcast %c16_i32 : i32 to vector<32x1xi32>
      %24 = arith.cmpi slt, %22, %23 : vector<32x1xi32>
      %cst = arith.constant 0.000000e+00 : f32
      %25 = vector.shape_cast %24 : vector<32x1xi1> to vector<32x1xi1>
      %26 = vector.broadcast %25 : vector<32x1xi1> to vector<32x128xi1>
      %27 = vector.broadcast %cst : f32 to vector<32x128xf32>
      %28 = arith.select %26, %18, %27 : vector<32x128xi1>, vector<32x128xf32>
      %29 = arith.mulf %28, %28 : vector<32x128xf32>
      %c0_8 = arith.constant 0 : index
      %c0_9 = arith.constant 0 : index
      %30 = vector.load %arg4[%c0_8, %c0_9] : memref<32x128xf32, #tpu.memory_space<vmem>>, vector<32x128xf32>
      %31 = vector.shape_cast %29 : vector<32x128xf32> to vector<1x32x128xf32>
      %cst_10 = arith.constant dense<0.000000e+00> : vector<32x128xf32>
      %32 = vector.multi_reduction <add>, %31, %cst_10 [0] : vector<1x32x128xf32> to vector<32x128xf32>
      %33 = arith.addf %30, %32 : vector<32x128xf32>
      %c0_11 = arith.constant 0 : index
      %c0_12 = arith.constant 0 : index
      %34 = vector.load %arg4[%c0_11, %c0_12] : memref<32x128xf32, #tpu.memory_space<vmem>>, vector<32x128xf32>
      tpu.vector_store %arg4[%c0_11, %c0_12], %33 {strides = array<i32>} : memref<32x128xf32, #tpu.memory_space<vmem>>, vector<32x128xf32>,
      %c1_i32_13 = arith.constant 1 : i32
    } else {
    }
    return
  }
  func.func @transform_0(%arg0: i32, %arg1: i32) -> (i32, i32) {
    %c1_i32 = arith.constant 1 : i32
    %0 = arith.muli %arg0, %c1_i32 : i32
    %1 = arith.addi %0, %arg1 : i32
    %c0_i32 = arith.constant 0 : i32
    %2 = arith.minsi %1, %c0_i32 : i32
    %c0_i32_0 = arith.constant 0 : i32
    %c0_i32_1 = arith.constant 0 : i32
    return %2, %c0_i32_0 : i32, i32
  }
  func.func @transform_1(%arg0: i32, %arg1: i32) -> (i32, i32) {
    %c1_i32 = arith.constant 1 : i32
    %0 = arith.muli %arg0, %c1_i32 : i32
    %1 = arith.addi %0, %arg1 : i32
    %c0_i32 = arith.constant 0 : i32
    %2 = arith.minsi %1, %c0_i32 : i32
    %c0_i32_0 = arith.constant 0 : i32
    %c0_i32_1 = arith.constant 0 : i32
    return %2, %c0_i32_0 : i32, i32
  }
  func.func @transform_2(%arg0: i32, %arg1: i32) -> (i32, i32) {
    %c0_i32 = arith.constant 0 : i32
    %c0_i32_0 = arith.constant 0 : i32
    return %arg0, %c0_i32 : i32, i32
  }
}

</mosaic_0001>

<bundles_post_ra>
// kernel: tpu_custom_call.1
= control target key start
LH: loop header
LB: loop body
LE: loop exit
PB: predicated region body
PF: predicated region fallthrough
CT: control target
= control target key end

     0   :  { %7 = vsyncpa [#allocation3], 0  ;;  %s334_s0 = inlined_call_operand.hbm [shape: f32[16,128], index: 0, kind: input, shape index: {}]   ;;  %s335_s1 = inlined_call_operand.hbm [shape: f32[16,128], index: 1, kind: input, shape index: {}]   ;;  %s336_s2 = inlined_call_operand.hbm [shape: f32[32,128], index: 2, kind: output, shape index: {}]  }
   0x1   :  { %8 = vsyncpa [#allocation6], 0 }
   0x2   :  { %9 = vsyncpa [#allocation4], 0 }
   0x3   :  { %20 = vsyncadd [#allocation3], 256  ;;  %s25_s11 = sshll.u32 %s334_s0, 4  ;;  %s295_s12 = smov [#allocation2]   ;;  %s26_s11 = int_to_ptr.hbm [resolvable:$true] %s25_s11 }
   0x4   :  { %s27_s13 = sshll.u32 %s295_s12, 4  ;;  %s296_s14 = smov 128   ;;  %s28_s13 = int_to_ptr.vmem [resolvable:$true] %s27_s13 }
   0x5   :  { %s297_s15 = smov 8  }
   0x6   :  { %33 = dma.hbm_to_vmem [thread:$0]  %s26_s11, 256, %s28_s13, [#allocation3], %s296_s14, %s296_s14, %s297_s15  }
   0x7   :  { %44 = vsyncadd [#allocation6], 256  ;;  %s49_s18 = sshll.u32 %s335_s1, 4  ;;  %s298_s19 = smov [#allocation5]   ;;  %s50_s18 = int_to_ptr.hbm [resolvable:$true] %s49_s18 }
   0x8   :  { %s51_s20 = sshll.u32 %s298_s19, 4  ;;  %s52_s20 = int_to_ptr.vmem [resolvable:$true] %s51_s20 }
   0x9   :  { %57 = dma.hbm_to_vmem [thread:$0]  %s50_s18, 256, %s52_s20, [#allocation6], %s296_s14, %s296_s14, %s297_s15  }
   0xa   :  { %289 = dma.done.wait [#allocation3], 512  }
   0xb   :  { %290 = vsyncadd [#allocation3], 4294966784 }
   0xc   :  { %291 = dma.done.wait [#allocation6], 512  }
   0xd   :  { %292 = vsyncadd [#allocation6], 4294966784  ;;  %v299_v0 = vmov 0.0   ;;  %v128_v1 = vld [vmem:[#allocation2] sm:$0xff]  ;;  %v129_v3 = vld [vmem:[#allocation2 + $0x8] sm:$0xff]  ;;  %s300_s0 = smov [#allocation7]  }
   0xe   :  { %185 = vst [vmem:[#allocation7 + $0x10] sm:$0xff] %v299_v0  ;;  %v132_v2 = vld [vmem:[#allocation5] sm:$0xff]  ;;  %v133_v5 = vld [vmem:[#allocation5 + $0x8] sm:$0xff]  ;;  %s191_s1 = sshll.u32 %s300_s0, 4  ;;  %s193_s23 = sshll.u32 %s336_s2, 4  ;;  %s192_s1 = int_to_ptr.vmem [resolvable:$true] %s191_s1  ;;  %s194_s23 = int_to_ptr.hbm [resolvable:$true] %s193_s23 }
   0xf   :  { %186 = vst [vmem:[#allocation7 + $0x18] sm:$0xff] %v299_v0  ;;  %v136_v4 = vsub.f32 %v128_v1, %v132_v2  ;;  %v137_v6 = vsub.f32 %v129_v3, %v133_v5 }
  0x11   :  { %v167_v7 = vmul.f32 %v136_v4, %v136_v4  ;;  %v168_v8 = vmul.f32 %v137_v6, %v137_v6 }
  0x13   :  { %183 = vst [vmem:[#allocation7] sm:$0xff] %v167_v7 }
  0x14   :  { %184 = vst [vmem:[#allocation7 + $0x8] sm:$0xff] %v168_v8 }
  0x15   :  { %199 = dma.vmem_to_hbm [thread:$0]  %s192_s1, 512, %s194_s23, [#allocation4], %s296_s14, %s296_s14, %s297_s15  }
  0x16   :  { %293 = dma.done.wait [#allocation4], 512  }
  0x17   :  { %294 = vsyncadd [#allocation4], 4294966784 }
  0x18   :  { %204 = vsyncpa [#allocation3], 1 }
  0x19   :  { %205 = vsyncpa [#allocation6], 1 }
  0x1a   :  { %206 = vsyncpa [#allocation4], 1 }

</bundles_post_ra>
